<compile_context>
chip_gen: v7x
topology: tpu7x:2x2x1
jax: 0.10.0
libtpu: 0.0.40
codegen_flags: <defaults>
</compile_context>

<pallas_src>
import jax
import jax.numpy as jnp
from jax.experimental import pallas as pl
from jax.experimental.pallas import tpu as pltpu


def _round_up(v: int, m: int) -> int:
    return ((v + m - 1) // m) * m


def _soft_ce_kernel(x_ref, t_ref, loss_ref):
    """Per-row soft-target cross entropy for one (block_rows, C) tile."""
    x = x_ref[...].astype(jnp.float32)   # (tm, C)
    t = t_ref[...].astype(jnp.float32)   # (tm, C)

    # numerically stable logsumexp along the class (lane) axis
    m = jnp.max(x, axis=-1, keepdims=True)                       # (tm, 1)
    z = x - m                                                    # (tm, C)
    lse = jnp.log(jnp.sum(jnp.exp(z), axis=-1, keepdims=True))   # (tm, 1)

    # sum(-t * (z - lse)) = lse * sum(t) - sum(t * z)
    sum_t = jnp.sum(t, axis=-1, keepdims=True)                   # (tm, 1)
    sum_tz = jnp.sum(t * z, axis=-1, keepdims=True)              # (tm, 1)

    loss_ref[...] = lse * sum_t - sum_tz                         # (tm, 1)


def two_label_soft_target_cross_entropy(x: jax.Array, target: jax.Array,
                                        *, block_rows: int | None = None
                                        ) -> jax.Array:
    """Pallas implementation of torch.sum(-t * log_softmax(x, -1), -1).mean()."""
    assert x.shape == target.shape and x.ndim >= 2
    c = x.shape[-1]
    x2 = x.reshape(-1, c)
    t2 = target.reshape(-1, c)
    n = x2.shape[0]

    x_item = jnp.dtype(x2.dtype).itemsize
    t_item = jnp.dtype(t2.dtype).itemsize

    if block_rows is None:
        # Double-buffered input footprint: 2 pipeline buffers * rows * C * bytes
        # per row for both inputs.  Target ~32 MiB of inputs, which leaves ample
        # headroom even on v7x (64 MiB physical VMEM per TC).
        input_budget = 32 * 1024 * 1024
        per_row_bytes = c * (x_item + t_item)
        rows = input_budget // (2 * max(per_row_bytes, 1))
        rows = max(128, min(rows, 4096))
        rows = (rows // 128) * 128
        # don't allocate a block much larger than the (padded) batch
        rows = min(rows, _round_up(n, 128))
        block_rows = rows
    assert block_rows % 128 == 0, "block_rows must be a multiple of 128"

    n_pad = _round_up(n, block_rows)
    if n_pad != n:
        pad = n_pad - n
        # zero-padded rows contribute exactly 0:  lse * 0 - 0 = 0
        x2 = jnp.pad(x2, ((0, pad), (0, 0)))
        t2 = jnp.pad(t2, ((0, pad), (0, 0)))
    num_blocks = n_pad // block_rows

    # Explicit VMEM limit instead of the scoped default (16/32 MiB), capped at
    # 48 MiB so it is always admissible on v7x as well as v5e/v6e.
    vmem_need = (2 * block_rows * c * (x_item + t_item)   # double-buffered inputs
                 + 2 * block_rows * 4)                    # double-buffered output
    vmem_limit = int(min(max(vmem_need + (8 << 20), 32 << 20), 48 << 20))

    per_row_loss = pl.pallas_call(
        _soft_ce_kernel,
        out_shape=jax.ShapeDtypeStruct((n_pad, 1), jnp.float32),
        grid_spec=pltpu.PrefetchScalarGridSpec(
            num_scalar_prefetch=0,
            grid=(num_blocks,),
            in_specs=[
                pl.BlockSpec((block_rows, c), lambda i: (i, 0)),
                pl.BlockSpec((block_rows, c), lambda i: (i, 0)),
            ],
            out_specs=pl.BlockSpec((block_rows, 1), lambda i: (i, 0)),
        ),
        compiler_params=pltpu.CompilerParams(
            dimension_semantics=("parallel",),
            vmem_limit_bytes=vmem_limit),
    )(x2, t2)

    # Final reduction + mean over the *real* batch size in the wrapper.
    return jnp.sum(per_row_loss) / jnp.float32(n)


if __name__ == "__main__":
    key = jax.random.PRNGKey(0)
    kx, kt = jax.random.split(key)

    N, C = 16, 32
    x = jax.random.normal(kx, (N, C), dtype=jnp.float32)
    # soft targets (rows sum to 1, like mixup/two-label soft targets)
    target = jax.nn.softmax(jax.random.normal(kt, (N, C), dtype=jnp.float32),
                            axis=-1)

    loss = jax.block_until_ready(two_label_soft_target_cross_entropy(x, target))

    # reference check in plain JAX
    ref = jnp.mean(jnp.sum(-target * jax.nn.log_softmax(x, axis=-1), axis=-1))
    assert jnp.allclose(loss, ref, rtol=1e-5, atol=1e-5), (loss, ref)

    print("KERNEL_OK")
</pallas_src>

<mosaic_0001>
module attributes {stable_mosaic.version = 11 : i64} {
  func.func @_soft_ce_kernel(%arg0: i32, %arg1: memref<128x32xf32, #tpu.memory_space<vmem>>, %arg2: memref<128x32xf32, #tpu.memory_space<vmem>>, %arg3: memref<128x1xf32, #tpu.memory_space<vmem>>) attributes {dimension_semantics = [#tpu.dimension_semantics<parallel>], iteration_bounds = array<i64: 1>, scalar_prefetch = 0 : i64, scratch_operands = 0 : i64, tpu.core_type = #tpu.core_type<tc>, window_params = [{transform_indices = @transform_0, window_bounds = array<i64: 128, 32>}, {transform_indices = @transform_1, window_bounds = array<i64: 128, 32>}, {transform_indices = @transform_2, window_bounds = array<i64: 128, 1>}]} {
    %c0 = arith.constant 0 : index
    %c0_0 = arith.constant 0 : index
    %0 = vector.load %arg1[%c0, %c0_0] : memref<128x32xf32, #tpu.memory_space<vmem>>, vector<128x32xf32>
    %c0_1 = arith.constant 0 : index
    %c0_2 = arith.constant 0 : index
    %1 = vector.load %arg2[%c0_1, %c0_2] : memref<128x32xf32, #tpu.memory_space<vmem>>, vector<128x32xf32>
    %cst = arith.constant dense<0xFF800000> : vector<128xf32>
    %2 = vector.multi_reduction <maximumf>, %0, %cst [1] : vector<128x32xf32> to vector<128xf32>
    %3 = vector.shape_cast %2 : vector<128xf32> to vector<128x1xf32>
    %4 = vector.broadcast %3 : vector<128x1xf32> to vector<128x32xf32>
    %5 = arith.subf %0, %4 : vector<128x32xf32>
    %6 = math.exp %5 : vector<128x32xf32>
    %cst_3 = arith.constant dense<0.000000e+00> : vector<128xf32>
    %7 = vector.multi_reduction <add>, %6, %cst_3 [1] : vector<128x32xf32> to vector<128xf32>
    %8 = vector.shape_cast %7 : vector<128xf32> to vector<128x1xf32>
    %9 = math.log %8 : vector<128x1xf32>
    %cst_4 = arith.constant dense<0.000000e+00> : vector<128xf32>
    %10 = vector.multi_reduction <add>, %1, %cst_4 [1] : vector<128x32xf32> to vector<128xf32>
    %11 = vector.shape_cast %10 : vector<128xf32> to vector<128x1xf32>
    %12 = arith.mulf %1, %5 : vector<128x32xf32>
    %cst_5 = arith.constant dense<0.000000e+00> : vector<128xf32>
    %13 = vector.multi_reduction <add>, %12, %cst_5 [1] : vector<128x32xf32> to vector<128xf32>
    %14 = vector.shape_cast %13 : vector<128xf32> to vector<128x1xf32>
    %15 = arith.mulf %9, %11 : vector<128x1xf32>
    %16 = arith.subf %15, %14 : vector<128x1xf32>
    %c0_6 = arith.constant 0 : index
    %c0_7 = arith.constant 0 : index
    %17 = vector.load %arg3[%c0_6, %c0_7] : memref<128x1xf32, #tpu.memory_space<vmem>>, vector<128x1xf32>
    tpu.vector_store %arg3[%c0_6, %c0_7], %16 {strides = array<i32>} : memref<128x1xf32, #tpu.memory_space<vmem>>, vector<128x1xf32>,
    return
  }
  func.func @transform_0(%arg0: i32) -> (i32, i32) {
    %c0_i32 = arith.constant 0 : i32
    %c0_i32_0 = arith.constant 0 : i32
    return %arg0, %c0_i32 : i32, i32
  }
  func.func @transform_1(%arg0: i32) -> (i32, i32) {
    %c0_i32 = arith.constant 0 : i32
    %c0_i32_0 = arith.constant 0 : i32
    return %arg0, %c0_i32 : i32, i32
  }
  func.func @transform_2(%arg0: i32) -> (i32, i32) {
    %c0_i32 = arith.constant 0 : i32
    %c0_i32_0 = arith.constant 0 : i32
    return %arg0, %c0_i32 : i32, i32
  }
}

</mosaic_0001>

<bundles_post_ra>
// kernel: tpu_custom_call.1
= control target key start
LH: loop header
LB: loop body
LE: loop exit
PB: predicated region body
PF: predicated region fallthrough
CT: control target
= control target key end

     0   :  { %vm43_vm0 = vcmask 261120   ;;  %vm364_vm1 = vcmask 7168   ;;  %s876_s0 = inlined_call_operand.vmem [shape: f32[128,32], index: 0, kind: input, shape index: {}]   ;;  %s877_s1 = inlined_call_operand.vmem [shape: f32[128,32], index: 1, kind: input, shape index: {}]   ;;  %s878_s2 = inlined_call_operand.vmem [shape: f32[128,1], index: 2, kind: output, shape index: {}]  }
   0x1   :  { %v467_v0 = vld [vmem:[%s876_s0] sm:$0xff]  ;;  %v472_v1 = vld [vmem:[%s876_s0 + $0x10] sm:$0xff]  ;;  %v477_v2 = vld [vmem:[%s876_s0 + $0x8] sm:$0xff] }
   0x2   :  { %v44_v3 = vsel %vm43_vm0, %v467_v0, -inf  ;;  %v50_v4 = vsel %vm43_vm0, %v472_v1, -inf  ;;  %v486_v5 = vld [vmem:[%s876_s0 + $0x18] sm:$0xff]  ;;  %v47_v6 = vsel %vm43_vm0, %v477_v2, -inf  ;;  %v495_v8 = vld [vmem:[%s876_s0 + $0x20] sm:$0xff]  ;;  %v500_v9 = vld [vmem:[%s876_s0 + $0x28] sm:$0xff] }
   0x3   :  { %45 = vmax.xlane.f32.xlu0 %v44_v3  ;;  %51 = vmax.xlane.f32.xlu1 %v50_v4  ;;  %v53_v7 = vsel %vm43_vm0, %v486_v5, -inf  ;;  %v56_v10 = vsel %vm43_vm0, %v495_v8, -inf  ;;  %v59_v11 = vsel %vm43_vm0, %v500_v9, -inf  ;;  %v509_v12 = vld [vmem:[%s876_s0 + $0x30] sm:$0xff]  ;;  %v514_v13 = vld [vmem:[%s876_s0 + $0x38] sm:$0xff]  ;;  %v523_v16 = vld [vmem:[%s876_s0 + $0x40] sm:$0xff] }
   0x4   :  { %v62_v14 = vsel %vm43_vm0, %v509_v12, -inf  ;;  %v65_v15 = vsel %vm43_vm0, %v514_v13, -inf  ;;  %v528_v17 = vld [vmem:[%s876_s0 + $0x48] sm:$0xff]  ;;  %v68_v18 = vsel %vm43_vm0, %v523_v16, -inf  ;;  %v537_v20 = vld [vmem:[%s876_s0 + $0x50] sm:$0xff]  ;;  %v542_v21 = vld [vmem:[%s876_s0 + $0x58] sm:$0xff] }
   0x5   :  { %v71_v19 = vsel %vm43_vm0, %v528_v17, -inf  ;;  %v74_v22 = vsel %vm43_vm0, %v537_v20, -inf  ;;  %v77_v23 = vsel %vm43_vm0, %v542_v21, -inf  ;;  %v551_v24 = vld [vmem:[%s876_s0 + $0x60] sm:$0xff]  ;;  %v556_v25 = vld [vmem:[%s876_s0 + $0x68] sm:$0xff]  ;;  %v565_v28 = vld [vmem:[%s876_s0 + $0x70] sm:$0xff] }
   0x6   :  { %v80_v26 = vsel %vm43_vm0, %v551_v24, -inf  ;;  %v83_v27 = vsel %vm43_vm0, %v556_v25, -inf  ;;  %v570_v29 = vld [vmem:[%s876_s0 + $0x78] sm:$0xff]  ;;  %v86_v30 = vsel %vm43_vm0, %v565_v28, -inf  ;;  %v27_v32 = vld [vmem:[%s877_s1] sm:$0xff]  ;;  %v582_v33 = vld [vmem:[%s877_s1 + $0x8] sm:$0xff] }
   0x7   :  { %48 = vmax.xlane.f32.xlu0 %v47_v6  ;;  %54 = vmax.xlane.f32.xlu1 %v53_v7  ;;  %v89_v31 = vsel %vm43_vm0, %v570_v29, -inf  ;;  %v220_v34 = vsel %vm43_vm0, %v27_v32, 0.0  ;;  %v223_v35 = vsel %vm43_vm0, %v582_v33, 0.0  ;;  %v29_v36 = vld [vmem:[%s877_s1 + $0x10] sm:$0xff]  ;;  %v30_v37 = vld [vmem:[%s877_s1 + $0x18] sm:$0xff]  ;;  %v598_v40 = vld [vmem:[%s877_s1 + $0x20] sm:$0xff] }
   0x8   :  { %v226_v38 = vsel %vm43_vm0, %v29_v36, 0.0  ;;  %v229_v39 = vsel %vm43_vm0, %v30_v37, 0.0  ;;  %v603_v41 = vld [vmem:[%s877_s1 + $0x28] sm:$0xff]  ;;  %v232_v42 = vsel %vm43_vm0, %v598_v40, 0.0  ;;  %v612_v44 = vld [vmem:[%s877_s1 + $0x30] sm:$0xff]  ;;  %v617_v45 = vld [vmem:[%s877_s1 + $0x38] sm:$0xff] }
   0x9   :  { %v235_v43 = vsel %vm43_vm0, %v603_v41, 0.0  ;;  %v238_v46 = vsel %vm43_vm0, %v612_v44, 0.0  ;;  %v241_v47 = vsel %vm43_vm0, %v617_v45, 0.0  ;;  %v626_v48 = vld [vmem:[%s877_s1 + $0x40] sm:$0xff]  ;;  %v631_v49 = vld [vmem:[%s877_s1 + $0x48] sm:$0xff]  ;;  %v640_v52 = vld [vmem:[%s877_s1 + $0x50] sm:$0xff] }
   0xa   :  { %v244_v50 = vsel %vm43_vm0, %v626_v48, 0.0  ;;  %v247_v51 = vsel %vm43_vm0, %v631_v49, 0.0  ;;  %v645_v53 = vld [vmem:[%s877_s1 + $0x58] sm:$0xff]  ;;  %v250_v54 = vsel %vm43_vm0, %v640_v52, 0.0  ;;  %v654_v56 = vld [vmem:[%s877_s1 + $0x60] sm:$0xff]  ;;  %v659_v57 = vld [vmem:[%s877_s1 + $0x68] sm:$0xff] }
   0xb   :  { %57 = vmax.xlane.f32.xlu0 %v56_v10  ;;  %60 = vmax.xlane.f32.xlu1 %v59_v11  ;;  %v253_v55 = vsel %vm43_vm0, %v645_v53, 0.0  ;;  %v256_v58 = vsel %vm43_vm0, %v654_v56, 0.0  ;;  %v259_v59 = vsel %vm43_vm0, %v659_v57, 0.0  ;;  %v668_v60 = vld [vmem:[%s877_s1 + $0x70] sm:$0xff]  ;;  %v673_v61 = vld [vmem:[%s877_s1 + $0x78] sm:$0xff] }
   0xc   :  { %v262_v62 = vsel %vm43_vm0, %v668_v60, 0.0  ;;  %v265_v63 = vsel %vm43_vm0, %v673_v61, 0.0 }
   0xf   :  { %63 = vmax.xlane.f32.xlu0 %v62_v14  ;;  %66 = vmax.xlane.f32.xlu1 %v65_v15 }
  0x13   :  { %69 = vmax.xlane.f32.xlu0 %v68_v18  ;;  %72 = vmax.xlane.f32.xlu1 %v71_v19 }
  0x17   :  { %75 = vmax.xlane.f32.xlu0 %v74_v22  ;;  %78 = vmax.xlane.f32.xlu1 %v77_v23 }
  0x1b   :  { %81 = vmax.xlane.f32.xlu0 %v80_v26  ;;  %84 = vmax.xlane.f32.xlu1 %v83_v27 }
  0x1f   :  { %87 = vmax.xlane.f32.xlu0 %v86_v30  ;;  %90 = vmax.xlane.f32.xlu1 %v89_v31 }
  0x23   :  { %221 = vadd.xlane.f32.xlu0 %v220_v34  ;;  %224 = vadd.xlane.f32.xlu1 %v223_v35 }
  0x27   :  { %227 = vadd.xlane.f32.xlu0 %v226_v38  ;;  %230 = vadd.xlane.f32.xlu1 %v229_v39 }
  0x2b   :  { %233 = vadd.xlane.f32.xlu0 %v232_v42  ;;  %236 = vadd.xlane.f32.xlu1 %v235_v43 }
  0x2f   :  { %239 = vadd.xlane.f32.xlu0 %v238_v46  ;;  %242 = vadd.xlane.f32.xlu1 %v241_v47 }
  0x33   :  { %245 = vadd.xlane.f32.xlu0 %v244_v50  ;;  %248 = vadd.xlane.f32.xlu1 %v247_v51 }
  0x37   :  { %251 = vadd.xlane.f32.xlu0 %v250_v54  ;;  %254 = vadd.xlane.f32.xlu1 %v253_v55 }
  0x3b   :  { %257 = vadd.xlane.f32.xlu0 %v256_v58  ;;  %260 = vadd.xlane.f32.xlu1 %v259_v59 }
  0x3f   :  { %263 = vadd.xlane.f32.xlu0 %v262_v62  ;;  %266 = vadd.xlane.f32.xlu1 %v265_v63 }
  0x90   :  { %v46_v3 = vpop.xlane.xlu0 %45  ;;  %v52_v4 = vpop.xlane.xlu1 %51 }
  0x91   :  { %v92_v6 = vsub.f32 %v467_v0, %v46_v3  ;;  %v94_v7 = vsub.f32 %v472_v1, %v52_v4 }
  0x93   :  { %v268_v10 = vmul.f32 %v92_v6, %v27_v32  ;;  %v270_v11 = vmul.f32 %v94_v7, %v29_v36  ;;  %v108_v14 = vmul.f32 1.442695, %v92_v6  ;;  %v112_v19 = vmul.f32 1.442695, %v94_v7 }
  0x94   :  { %v49_v15 = vpop.xlane.xlu0 %48  ;;  %v55_v18 = vpop.xlane.xlu1 %54 }
  0x95   :  { %v93_v22 = vsub.f32 %v477_v2, %v49_v15  ;;  %v284_v23 = vsel %vm43_vm0, %v268_v10, 0.0  ;;  %v95_v26 = vsub.f32 %v486_v5, %v55_v18  ;;  %v290_v30 = vsel %vm43_vm0, %v270_v11, 0.0 }
  0x96   :  { %285 = vadd.xlane.f32.xlu0 %v284_v23  ;;  %385 = vpow2.f32 %v108_v14 }
  0x97   :  { %v110_v27 = vmul.f32 1.442695, %v93_v22  ;;  %v269_v0 = vmul.f32 %v93_v22, %v582_v33  ;;  %v271_v31 = vmul.f32 %v95_v26, %v30_v37  ;;  %387 = vpow2.f32 %v112_v19 }
  0x98   :  { %v58_v1 = vpop.xlane.xlu0 %57  ;;  %v61_v32 = vpop.xlane.xlu1 %60  ;;  %v114_v37 = vmul.f32 1.442695, %v95_v26 }
  0x99   :  { %v96_v34 = vsub.f32 %v495_v8, %v58_v1  ;;  %v287_v35 = vsel %vm43_vm0, %v269_v0, 0.0  ;;  %v97_v2 = vsub.f32 %v500_v9, %v61_v32  ;;  %389 = vpow2.f32 %v110_v27 }
  0x9a   :  { %291 = vadd.xlane.f32.xlu0 %v290_v30  ;;  %288 = vadd.xlane.f32.xlu1 %v287_v35  ;;  %v293_v36 = vsel %vm43_vm0, %v271_v31, 0.0 }
  0x9b   :  { %v116_v5 = vmul.f32 1.442695, %v96_v34  ;;  %v272_v38 = vmul.f32 %v96_v34, %v598_v40  ;;  %v273_v33 = vmul.f32 %v97_v2, %v603_v41  ;;  %v118_v41 = vmul.f32 1.442695, %v97_v2 }
  0x9c   :  { %v64_v39 = vpop.xlane.xlu0 %63  ;;  %v67_v42 = vpop.xlane.xlu1 %66 }
  0x9d   :  { %v98_v43 = vsub.f32 %v509_v12, %v64_v39  ;;  %v296_v8 = vsel %vm43_vm0, %v272_v38, 0.0  ;;  %v99_v46 = vsub.f32 %v514_v13, %v67_v42  ;;  %391 = vpow2.f32 %v116_v5 }
  0x9e   :  { %294 = vadd.xlane.f32.xlu1 %v293_v36  ;;  %297 = vadd.xlane.f32.xlu0 %v296_v8  ;;  %v299_v47 = vsel %vm43_vm0, %v273_v33, 0.0  ;;  %393 = vpow2.f32 %v114_v37 }
  0x9f   :  { %v120_v9 = vmul.f32 1.442695, %v98_v43  ;;  %v274_v50 = vmul.f32 %v98_v43, %v612_v44  ;;  %v275_v40 = vmul.f32 %v99_v46, %v617_v45  ;;  %v122_v63 = vmul.f32 1.442695, %v99_v46 }
  0xa0   :  { %v70_v51 = vpop.xlane.xlu0 %69  ;;  %v73_v54 = vpop.xlane.xlu1 %72 }
  0xa1   :  { %v302_v12 = vsel %vm43_vm0, %v274_v50, 0.0  ;;  %v700_v55 = vsub.f32 %v523_v16, %v70_v51  ;;  %v386_v13 = vpop.eup %385  ;;  %395 = vpow2.f32 %v120_v9  ;;  %v703_v58 = vsub.f32 %v528_v17, %v73_v54 }
  0xa2   :  { %300 = vadd.xlane.f32.xlu1 %v299_v47  ;;  %303 = vadd.xlane.f32.xlu0 %v302_v12  ;;  %v388_v59 = vpop.eup %387  ;;  %v305_v45 = vsel %vm43_vm0, %v275_v40, 0.0  ;;  %397 = vpow2.f32 %v118_v41  ;;  %v140_v16 = vsel %vm43_vm0, %v386_v13, 0.0 }
  0xa3   :  { %v124_v44 = vmul.f32 1.442695, %v700_v55  ;;  %v390_v62 = vpop.eup %389  ;;  %v126_v6 = vmul.f32 1.442695, %v703_v58  ;;  %v146_v15 = vsel %vm43_vm0, %v388_v59, 0.0  ;;  %v276_v12 = vmul.f32 %v700_v55, %v626_v48 }
  0xa4   :  { %v76_v3 = vpop.xlane.xlu0 %75  ;;  %v79_v4 = vpop.xlane.xlu1 %78  ;;  %v143_v14 = vsel %vm43_vm0, %v390_v62, 0.0 }
  0xa5   :  { %v710_v7 = vsub.f32 %v537_v20, %v76_v3  ;;  %v713_v17 = vsub.f32 %v542_v21, %v79_v4  ;;  %399 = vpow2.f32 %v124_v44  ;;  %v308_v59 = vsel %vm43_vm0, %v276_v12, 0.0 }
  0xa6   :  { %306 = vadd.xlane.f32.xlu1 %v305_v45  ;;  %141 = vadd.xlane.f32.xlu0 %v140_v16  ;;  %401 = vpow2.f32 %v122_v63  ;;  %v277_v44 = vmul.f32 %v703_v58, %v631_v49 }
  0xa7   :  { %v128_v10 = vmul.f32 1.442695, %v710_v7  ;;  %v392_v11 = vpop.eup %391  ;;  %403 = vpow2.f32 %v126_v6  ;;  %v130_v20 = vmul.f32 1.442695, %v713_v17  ;;  %v278_v45 = vmul.f32 %v710_v7, %v640_v52 }
  0xa8   :  { %v82_v18 = vpop.xlane.xlu0 %81  ;;  %v85_v19 = vpop.xlane.xlu1 %84  ;;  %v152_v27 = vsel %vm43_vm0, %v392_v11, 0.0  ;;  %v311_v62 = vsel %vm43_vm0, %v277_v44, 0.0  ;;  %v279_v48 = vmul.f32 %v713_v17, %v645_v53 }
  0xa9   :  { %v720_v22 = vsub.f32 %v551_v24, %v82_v18  ;;  %v723_v21 = vsub.f32 %v556_v25, %v85_v19  ;;  %v394_v23 = vpop.eup %393  ;;  %405 = vpow2.f32 %v128_v10  ;;  %v314_v63 = vsel %vm43_vm0, %v278_v45, 0.0 }
  0xaa   :  { %144 = vadd.xlane.f32.xlu1 %v143_v14  ;;  %147 = vadd.xlane.f32.xlu0 %v146_v15  ;;  %407 = vpow2.f32 %v130_v20  ;;  %v149_v1 = vsel %vm43_vm0, %v394_v23, 0.0  ;;  %v317_v3 = vsel %vm43_vm0, %v279_v48, 0.0 }
  0xab   :  { %v132_v26 = vmul.f32 1.442695, %v720_v22  ;;  %v396_v30 = vpop.eup %395  ;;  %v134_v24 = vmul.f32 1.442695, %v723_v21  ;;  %v280_v55 = vmul.f32 %v720_v22, %v654_v56  ;;  %v281_v52 = vmul.f32 %v723_v21, %v659_v57 }
  0xac   :  { %v88_v0 = vpop.xlane.xlu0 %87  ;;  %v91_v31 = vpop.xlane.xlu1 %90  ;;  %v158_v2 = vsel %vm43_vm0, %v396_v30, 0.0 }
  0xad   :  { %v106_v32 = vsub.f32 %v565_v28, %v88_v0  ;;  %v398_v25 = vpop.eup %397  ;;  %409 = vpow2.f32 %v132_v26  ;;  %v107_v34 = vsub.f32 %v570_v29, %v91_v31  ;;  %v320_v49 = vsel %vm43_vm0, %v280_v55, 0.0 }
  0xae   :  { %150 = vadd.xlane.f32.xlu1 %v149_v1  ;;  %153 = vadd.xlane.f32.xlu0 %v152_v27  ;;  %411 = vpow2.f32 %v134_v24  ;;  %v155_v36 = vsel %vm43_vm0, %v398_v25, 0.0  ;;  %v323_v4 = vsel %vm43_vm0, %v281_v52, 0.0 }
  0xaf   :  { %v136_v35 = vmul.f32 1.442695, %v106_v32  ;;  %v400_v5 = vpop.eup %399  ;;  %v138_v33 = vmul.f32 1.442695, %v107_v34  ;;  %v282_v58 = vmul.f32 %v106_v32, %v668_v60  ;;  %v283_v16 = vmul.f32 %v107_v34, %v673_v61 }
  0xb0   :  { %v402_v38 = vpop.eup %401  ;;  %v164_v28 = vsel %vm43_vm0, %v400_v5, 0.0  ;;  %v222_v6 = vpop.xlane.xlu0 %221 }
  0xb1   :  { %413 = vpow2.f32 %v136_v35  ;;  %v404_v37 = vpop.eup %403  ;;  %v161_v42 = vsel %vm43_vm0, %v402_v38, 0.0  ;;  %v326_v53 = vsel %vm43_vm0, %v282_v58, 0.0  ;;  %v329_v56 = vsel %vm43_vm0, %v283_v16, 0.0  ;;  %v225_v7 = vpop.xlane.xlu1 %224 }
  0xb2   :  { %156 = vadd.xlane.f32.xlu1 %v155_v36  ;;  %159 = vadd.xlane.f32.xlu0 %v158_v2  ;;  %415 = vpow2.f32 %v138_v33  ;;  %v167_v43 = vsel %vm43_vm0, %v404_v37, 0.0 }
  0xb3   :  { %v406_v39 = vpop.eup %405 }
  0xb4   :  { %v408_v29 = vpop.eup %407  ;;  %v170_v8 = vsel %vm43_vm0, %v406_v39, 0.0  ;;  %v228_v17 = vpop.xlane.xlu0 %227 }
  0xb5   :  { %v173_v47 = vsel %vm43_vm0, %v408_v29, 0.0  ;;  %v231_v10 = vpop.xlane.xlu1 %230 }
  0xb6   :  { %162 = vadd.xlane.f32.xlu1 %v161_v42  ;;  %165 = vadd.xlane.f32.xlu0 %v164_v28 }
  0xb7   :  { %v410_v46 = vpop.eup %409 }
  0xb8   :  { %v412_v9 = vpop.eup %411  ;;  %v176_v50 = vsel %vm43_vm0, %v410_v46, 0.0  ;;  %v764_v57 = vpop.xlane.xlu0 %233 }
  0xb9   :  { %v179_v41 = vsel %vm43_vm0, %v412_v9, 0.0  ;;  %v766_v60 = vpop.xlane.xlu1 %236 }
  0xba   :  { %168 = vadd.xlane.f32.xlu1 %v167_v43  ;;  %171 = vadd.xlane.f32.xlu0 %v170_v8 }
  0xbb   :  { %v414_v40 = vpop.eup %413 }
  0xbc   :  { %v182_v51 = vsel %vm43_vm0, %v414_v40, 0.0  ;;  %v416_v54 = vpop.eup %415  ;;  %v768_v11 = vpop.xlane.xlu0 %239 }
  0xbd   :  { %v185_v13 = vsel %vm43_vm0, %v416_v54, 0.0  ;;  %v770_v14 = vpop.xlane.xlu1 %242 }
  0xbe   :  { %174 = vadd.xlane.f32.xlu1 %v173_v47  ;;  %177 = vadd.xlane.f32.xlu0 %v176_v50 }
  0xc0   :  { %v772_v15 = vpop.xlane.xlu0 %245 }
  0xc1   :  { %v774_v61 = vpop.xlane.xlu1 %248 }
  0xc2   :  { %180 = vadd.xlane.f32.xlu1 %v179_v41  ;;  %183 = vadd.xlane.f32.xlu0 %v182_v51 }
  0xc4   :  { %v776_v18 = vpop.xlane.xlu0 %251 }
  0xc5   :  { %v778_v19 = vpop.xlane.xlu1 %254 }
  0xc6   :  { %186 = vadd.xlane.f32.xlu1 %v185_v13  ;;  %309 = vadd.xlane.f32.xlu0 %v308_v59 }
  0xc8   :  { %v780_v20 = vpop.xlane.xlu0 %257 }
  0xc9   :  { %v782_v22 = vpop.xlane.xlu1 %260 }
  0xca   :  { %312 = vadd.xlane.f32.xlu1 %v311_v62  ;;  %315 = vadd.xlane.f32.xlu0 %v314_v63 }
  0xcc   :  { %v784_v21 = vpop.xlane.xlu0 %263 }
  0xcd   :  { %v786_v23 = vpop.xlane.xlu1 %266 }
  0xce   :  { %318 = vadd.xlane.f32.xlu1 %v317_v3  ;;  %321 = vadd.xlane.f32.xlu0 %v320_v49 }
  0xd2   :  { %324 = vadd.xlane.f32.xlu1 %v323_v4  ;;  %327 = vadd.xlane.f32.xlu0 %v326_v53 }
  0xd6   :  { %330 = vadd.xlane.f32.xlu1 %v329_v56 }
 0x123   :  { %v286_v26 = vpop.xlane.xlu0 %285 }
 0x127   :  { %v289_v27 = vpop.xlane.xlu1 %288  ;;  %v292_v30 = vpop.xlane.xlu0 %291 }
 0x12b   :  { %v295_v0 = vpop.xlane.xlu1 %294  ;;  %v788_v31 = vpop.xlane.xlu0 %297 }
 0x12f   :  { %v790_v1 = vpop.xlane.xlu1 %300  ;;  %v792_v24 = vpop.xlane.xlu0 %303 }
 0x133   :  { %v794_v32 = vpop.xlane.xlu1 %306  ;;  %v142_v25 = vpop.xlane.xlu0 %141 }
 0x134   :  { %417 = vlog2.f32 %v142_v25 }
 0x137   :  { %v145_v34 = vpop.xlane.xlu1 %144  ;;  %v148_v35 = vpop.xlane.xlu0 %147 }
 0x138   :  { %419 = vlog2.f32 %v145_v34 }
 0x139   :  { %421 = vlog2.f32 %v148_v35 }
 0x13b   :  { %v151_v2 = vpop.xlane.xlu1 %150  ;;  %v154_v5 = vpop.xlane.xlu0 %153 }
 0x13c   :  { %423 = vlog2.f32 %v151_v2 }
 0x13d   :  { %425 = vlog2.f32 %v154_v5 }
 0x13e   :  { %v418_v36 = vpop.eup %417 }
 0x13f   :  { %v189_v38 = vmul.f32 0.6931472, %v418_v36  ;;  %v157_v33 = vpop.xlane.xlu1 %156  ;;  %v160_v37 = vpop.xlane.xlu0 %159 }
 0x140   :  { %427 = vlog2.f32 %v157_v33 }
 0x141   :  { %v332_v28 = vmul.f32 %v222_v6, %v189_v38  ;;  %429 = vlog2.f32 %v160_v37 }
 0x142   :  { %v420_v39 = vpop.eup %419 }
 0x143   :  { %v422_v42 = vpop.eup %421  ;;  %v348_v29 = vsub.f32 %v332_v28, %v286_v26  ;;  %v191_v43 = vmul.f32 0.6931472, %v420_v39  ;;  %v163_v8 = vpop.xlane.xlu1 %162 }
 0x144   :  { %v166_v46 = vpop.xlane.xlu0 %165  ;;  %v193_v9 = vmul.f32 0.6931472, %v422_v42  ;;  %431 = vlog2.f32 %v163_v8 }
 0x145   :  { %365 = vst.msk [vmem:[%s878_s2] sm:$0xff] %vm364_vm1, %v348_v29  ;;  %v333_v47 = vmul.f32 %v225_v7, %v191_v43  ;;  %433 = vlog2.f32 %v166_v46 }
 0x146   :  { %v424_v50 = vpop.eup %423  ;;  %v334_v40 = vmul.f32 %v228_v17, %v193_v9 }
 0x147   :  { %v426_v41 = vpop.eup %425  ;;  %v349_v51 = vsub.f32 %v333_v47, %v289_v27  ;;  %v195_v54 = vmul.f32 0.6931472, %v424_v50  ;;  %v169_v12 = vpop.xlane.xlu1 %168 }
 0x148   :  { %v172_v13 = vpop.xlane.xlu0 %171  ;;  %v350_v59 = vsub.f32 %v334_v40, %v292_v30  ;;  %v197_v44 = vmul.f32 0.6931472, %v426_v41  ;;  %435 = vlog2.f32 %v169_v12 }
 0x149   :  { %366 = vst.msk [vmem:[%s878_s2 + $0x8] sm:$0xff] %vm364_vm1, %v349_v51  ;;  %v335_v45 = vmul.f32 %v231_v10, %v195_v54  ;;  %437 = vlog2.f32 %v172_v13 }
 0x14a   :  { %v428_v62 = vpop.eup %427  ;;  %367 = vst.msk [vmem:[%s878_s2 + $0x10] sm:$0xff] %vm364_vm1, %v350_v59  ;;  %v336_v63 = vmul.f32 %v764_v57, %v197_v44 }
 0x14b   :  { %v430_v48 = vpop.eup %429  ;;  %v351_v55 = vsub.f32 %v335_v45, %v295_v0  ;;  %v199_v3 = vmul.f32 0.6931472, %v428_v62  ;;  %v175_v49 = vpop.xlane.xlu1 %174 }
 0x14c   :  { %v178_v52 = vpop.xlane.xlu0 %177  ;;  %v352_v58 = vsub.f32 %v336_v63, %v788_v31  ;;  %v201_v4 = vmul.f32 0.6931472, %v430_v48  ;;  %439 = vlog2.f32 %v175_v49 }
 0x14d   :  { %368 = vst.msk [vmem:[%s878_s2 + $0x18] sm:$0xff] %vm364_vm1, %v351_v55  ;;  %v337_v53 = vmul.f32 %v766_v60, %v199_v3  ;;  %441 = vlog2.f32 %v178_v52 }
 0x14e   :  { %v432_v16 = vpop.eup %431  ;;  %369 = vst.msk [vmem:[%s878_s2 + $0x20] sm:$0xff] %vm364_vm1, %v352_v58  ;;  %v338_v56 = vmul.f32 %v768_v11, %v201_v4 }
 0x14f   :  { %v434_v6 = vpop.eup %433  ;;  %v353_v7 = vsub.f32 %v337_v53, %v790_v1  ;;  %v203_v17 = vmul.f32 0.6931472, %v432_v16  ;;  %v181_v10 = vpop.xlane.xlu1 %180 }
 0x150   :  { %v184_v57 = vpop.xlane.xlu0 %183  ;;  %v354_v26 = vsub.f32 %v338_v56, %v792_v24  ;;  %v205_v27 = vmul.f32 0.6931472, %v434_v6  ;;  %443 = vlog2.f32 %v181_v10 }
 0x151   :  { %370 = vst.msk [vmem:[%s878_s2 + $0x28] sm:$0xff] %vm364_vm1, %v353_v7  ;;  %v339_v60 = vmul.f32 %v770_v14, %v203_v17  ;;  %445 = vlog2.f32 %v184_v57 }
 0x152   :  { %v436_v30 = vpop.eup %435  ;;  %371 = vst.msk [vmem:[%s878_s2 + $0x30] sm:$0xff] %vm364_vm1, %v354_v26  ;;  %v340_v11 = vmul.f32 %v772_v15, %v205_v27 }
 0x153   :  { %v438_v0 = vpop.eup %437  ;;  %v355_v31 = vsub.f32 %v339_v60, %v794_v32  ;;  %v207_v1 = vmul.f32 0.6931472, %v436_v30  ;;  %v187_v24 = vpop.xlane.xlu1 %186 }
 0x154   :  { %v310_v25 = vpop.xlane.xlu0 %309  ;;  %v209_v34 = vmul.f32 0.6931472, %v438_v0  ;;  %447 = vlog2.f32 %v187_v24 }
 0x155   :  { %v356_v35 = vsub.f32 %v340_v11, %v310_v25  ;;  %372 = vst.msk [vmem:[%s878_s2 + $0x38] sm:$0xff] %vm364_vm1, %v355_v31  ;;  %v341_v14 = vmul.f32 %v774_v61, %v207_v1 }
 0x156   :  { %v440_v2 = vpop.eup %439  ;;  %v342_v15 = vmul.f32 %v776_v18, %v209_v34 }
 0x157   :  { %373 = vst.msk [vmem:[%s878_s2 + $0x40] sm:$0xff] %vm364_vm1, %v356_v35  ;;  %v442_v32 = vpop.eup %441  ;;  %v211_v5 = vmul.f32 0.6931472, %v440_v2  ;;  %v313_v36 = vpop.xlane.xlu1 %312 }
 0x158   :  { %v316_v38 = vpop.xlane.xlu0 %315  ;;  %v213_v33 = vmul.f32 0.6931472, %v442_v32  ;;  %v357_v37 = vsub.f32 %v341_v14, %v313_v36 }
 0x159   :  { %v358_v28 = vsub.f32 %v342_v15, %v316_v38  ;;  %v343_v39 = vmul.f32 %v778_v19, %v211_v5 }
 0x15a   :  { %v444_v42 = vpop.eup %443  ;;  %374 = vst.msk [vmem:[%s878_s2 + $0x48] sm:$0xff] %vm364_vm1, %v357_v37  ;;  %v344_v61 = vmul.f32 %v780_v20, %v213_v33 }
 0x15b   :  { %375 = vst.msk [vmem:[%s878_s2 + $0x50] sm:$0xff] %vm364_vm1, %v358_v28  ;;  %v446_v18 = vpop.eup %445  ;;  %v215_v29 = vmul.f32 0.6931472, %v444_v42  ;;  %v319_v43 = vpop.xlane.xlu1 %318 }
 0x15c   :  { %v322_v8 = vpop.xlane.xlu0 %321  ;;  %v217_v46 = vmul.f32 0.6931472, %v446_v18  ;;  %v359_v9 = vsub.f32 %v343_v39, %v319_v43 }
 0x15d   :  { %v360_v19 = vsub.f32 %v344_v61, %v322_v8  ;;  %v345_v47 = vmul.f32 %v782_v22, %v215_v29 }
 0x15e   :  { %v448_v50 = vpop.eup %447  ;;  %376 = vst.msk [vmem:[%s878_s2 + $0x58] sm:$0xff] %vm364_vm1, %v359_v9  ;;  %v346_v20 = vmul.f32 %v784_v21, %v217_v46 }
 0x15f   :  { %377 = vst.msk [vmem:[%s878_s2 + $0x60] sm:$0xff] %vm364_vm1, %v360_v19  ;;  %v219_v40 = vmul.f32 0.6931472, %v448_v50  ;;  %v325_v41 = vpop.xlane.xlu1 %324 }
 0x160   :  { %v328_v51 = vpop.xlane.xlu0 %327  ;;  %v361_v54 = vsub.f32 %v345_v47, %v325_v41 }
 0x161   :  { %v362_v12 = vsub.f32 %v346_v20, %v328_v51  ;;  %v347_v22 = vmul.f32 %v786_v23, %v219_v40 }
 0x162   :  { %378 = vst.msk [vmem:[%s878_s2 + $0x68] sm:$0xff] %vm364_vm1, %v361_v54 }
 0x163   :  { %379 = vst.msk [vmem:[%s878_s2 + $0x70] sm:$0xff] %vm364_vm1, %v362_v12  ;;  %v331_v13 = vpop.xlane.xlu1 %330 }
 0x164   :  { %v363_v59 = vsub.f32 %v347_v22, %v331_v13 }
 0x166   :  { %380 = vst.msk [vmem:[%s878_s2 + $0x78] sm:$0xff] %vm364_vm1, %v363_v59 }

</bundles_post_ra>
